<compile_context>
chip_gen: v5e
topology: v5e:2x2
jax: 0.10.0
libtpu: 0.0.40
codegen_flags: <defaults>
</compile_context>

<pallas_src>
import functools

import jax
import jax.numpy as jnp
from jax.experimental import pallas as pl
from jax.experimental.pallas import tpu as pltpu

KH = KW = 3
BN_EPS = 1e-5


def _double_conv_kernel(x_ref, masks_ref, w1_ref, b1_ref, w2_ref, b2_ref, o_ref, *, W):
    """One group of B packed images per grid step.

    x_ref:    (Cin,  B*HW)   input, B images contiguous along lanes
    masks_ref:(9,    B*HW)   per-tap boundary validity masks (f32 0/1), tiled per image
    w*_ref:   (Cout, 9*C)    conv weights with BN scale folded in; K = (dy*3+dx)*C + ci
    b*_ref:   (Cout, 1)      folded bias (conv bias + BN), per output channel
    o_ref:    (Cout, B*HW)   output, lane-dense
    """
    BHW = x_ref.shape[1]

    def tap_stack(a):
        # a: (C, BHW).  For tap t with offsets (oy, ox): shifted[q] = a[q + oy*W + ox],
        # zeroed where the neighbour falls outside its image (mask handles both plane
        # boundaries and wrap across packed images).  Rolls hit the XLU, not the VPU.
        rows = []
        for t in range(KH * KW):
            oy = t // KW - 1
            ox = t % KW - 1
            s = oy * W + ox
            if t == (KH * KW) // 2:           # center tap: no shift, mask is all ones
                rows.append(a)
            else:
                rolled = pltpu.roll(a, shift=(-s) % BHW, axis=1)
                rows.append(rolled * masks_ref[t:t + 1, :])
        return jnp.concatenate(rows, axis=0)   # (9*C, BHW)

    x = x_ref[...].astype(jnp.float32)

    # ---- Conv1 + folded BN1 + ReLU (one MXU matmul, K = 9*Cin, N = B*HW) ----
    y1 = jnp.maximum(
        jnp.dot(w1_ref[...], tap_stack(x), preferred_element_type=jnp.float32)
        + b1_ref[...], 0.0)                    # (Cout, BHW)

    # ---- Conv2 + folded BN2 + ReLU (one MXU matmul, K = 9*Cout, N = B*HW) ----
    y2 = jnp.maximum(
        jnp.dot(w2_ref[...], tap_stack(y1), preferred_element_type=jnp.float32)
        + b2_ref[...], 0.0)
    o_ref[...] = y2.astype(o_ref.dtype)


def _fold_bn(conv_bias, gamma, beta, mean, var, eps=BN_EPS):
    """Fold eval-mode BatchNorm (+ conv bias) into per-channel (scale, bias)."""
    scale = gamma / jnp.sqrt(var + eps)
    bias = scale * (conv_bias - mean) + beta
    return scale.astype(jnp.float32), bias.astype(jnp.float32)


def _tap_masks(H, W):
    """(9, H*W) f32 validity masks: tap t=(dy*3+dx) valid where (i+dy-1, j+dx-1) in-plane."""
    ii = jnp.arange(H)[:, None]
    jj = jnp.arange(W)[None, :]
    masks = []
    for t in range(KH * KW):
        oy, ox = t // KW - 1, t % KW - 1
        m = (ii + oy >= 0) & (ii + oy < H) & (jj + ox >= 0) & (jj + ox < W)
        masks.append(m.reshape(-1))
    return jnp.stack(masks).astype(jnp.float32)


def double_conv_block(x, p):
    """x: (N, Cin, H, W) float32.  p: dict of parameters (see main)."""
    N, Cin, H, W = x.shape
    Cout = p["w1"].shape[0]
    HW = H * W

    # Keep 2 parallel grid steps when the batch allows (v7x has 2 TensorCores); pack the
    # remaining batch into the lane axis of each step.
    G = 2 if (N % 2 == 0 and N >= 2) else 1
    B = N // G
    BHW = B * HW

    s1, b1 = _fold_bn(p["cb1"], p["g1"], p["be1"], p["m1"], p["v1"])
    s2, b2 = _fold_bn(p["cb2"], p["g2"], p["be2"], p["m2"], p["v2"])

    # (Cout, Cin, 3, 3) -> (Cout, 9*Cin), K index = (dy*3+dx)*Cin + ci (tap-major),
    # matching the tap-stack row ordering built inside the kernel.  BN scale folded in.
    w1m = (jnp.transpose(p["w1"], (0, 2, 3, 1)).reshape(Cout, KH * KW * Cin)
           * s1[:, None]).astype(jnp.float32)
    w2m = (jnp.transpose(p["w2"], (0, 2, 3, 1)).reshape(Cout, KH * KW * Cout)
           * s2[:, None]).astype(jnp.float32)

    masks = jnp.tile(_tap_masks(H, W), (1, B))                       # (9, B*HW)

    # Pack images onto lanes: x_packed[c, n*HW + p] = x[n, c, p].
    x_packed = (x.reshape(N, Cin, HW).transpose(1, 0, 2)
                .reshape(Cin, N * HW).astype(jnp.float32))

    kernel = functools.partial(_double_conv_kernel, W=W)

    out = pl.pallas_call(
        kernel,
        out_shape=jax.ShapeDtypeStruct((Cout, N * HW), jnp.float32),
        grid_spec=pltpu.PrefetchScalarGridSpec(
            num_scalar_prefetch=0,
            grid=(G,),
            in_specs=[
                pl.BlockSpec((Cin, BHW), lambda g: (0, g)),               # x (packed)
                pl.BlockSpec((KH * KW, BHW), lambda g: (0, 0)),           # tap masks
                pl.BlockSpec((Cout, KH * KW * Cin), lambda g: (0, 0)),    # w1 (scale folded)
                pl.BlockSpec((Cout, 1), lambda g: (0, 0)),                # b1
                pl.BlockSpec((Cout, KH * KW * Cout), lambda g: (0, 0)),   # w2 (scale folded)
                pl.BlockSpec((Cout, 1), lambda g: (0, 0)),                # b2
            ],
            out_specs=pl.BlockSpec((Cout, BHW), lambda g: (0, g)),
        ),
        compiler_params=pltpu.CompilerParams(
            dimension_semantics=("parallel",)),    # grid steps -> both TCs on v7x
    )(x_packed, masks, w1m, b1.reshape(Cout, 1), w2m, b2.reshape(Cout, 1))

    return (out.reshape(Cout, N, HW).transpose(1, 0, 2)
            .reshape(N, Cout, H, W))


def _reference(x, p):
    """Pure-JAX reference of the PyTorch forward (eval-mode BN)."""
    def conv(x, w, b):
        y = jax.lax.conv_general_dilated(
            x, w, window_strides=(1, 1), padding=((1, 1), (1, 1)),
            dimension_numbers=("NCHW", "OIHW", "NCHW"),
            precision=jax.lax.Precision.HIGHEST)
        return y + b[None, :, None, None]

    def bn(x, g, beta, m, v, eps=BN_EPS):
        return (g[None, :, None, None] * (x - m[None, :, None, None])
                / jnp.sqrt(v[None, :, None, None] + eps) + beta[None, :, None, None])

    y = jax.nn.relu(bn(conv(x, p["w1"], p["cb1"]), p["g1"], p["be1"], p["m1"], p["v1"]))
    y = jax.nn.relu(bn(conv(y, p["w2"], p["cb2"]), p["g2"], p["be2"], p["m2"], p["v2"]))
    return y


if __name__ == "__main__":
    N, Cin, Cout, H, W = 2, 4, 8, 16, 16

    key = jax.random.PRNGKey(0)
    keys = jax.random.split(key, 16)

    x = jax.random.normal(keys[0], (N, Cin, H, W), jnp.float32)

    p = {
        # conv1 / bn1
        "w1": 0.1 * jax.random.normal(keys[1], (Cout, Cin, KH, KW), jnp.float32),
        "cb1": 0.1 * jax.random.normal(keys[2], (Cout,), jnp.float32),
        "g1": 1.0 + 0.1 * jax.random.normal(keys[3], (Cout,), jnp.float32),
        "be1": 0.1 * jax.random.normal(keys[4], (Cout,), jnp.float32),
        "m1": 0.1 * jax.random.normal(keys[5], (Cout,), jnp.float32),
        "v1": 0.5 + jnp.abs(jax.random.normal(keys[6], (Cout,), jnp.float32)),
        # conv2 / bn2
        "w2": 0.1 * jax.random.normal(keys[7], (Cout, Cout, KH, KW), jnp.float32),
        "cb2": 0.1 * jax.random.normal(keys[8], (Cout,), jnp.float32),
        "g2": 1.0 + 0.1 * jax.random.normal(keys[9], (Cout,), jnp.float32),
        "be2": 0.1 * jax.random.normal(keys[10], (Cout,), jnp.float32),
        "m2": 0.1 * jax.random.normal(keys[11], (Cout,), jnp.float32),
        "v2": 0.5 + jnp.abs(jax.random.normal(keys[12], (Cout,), jnp.float32)),
    }

    out = double_conv_block(x, p)
    out = jax.block_until_ready(out)

    ref = jax.block_until_ready(_reference(x, p))
    assert out.shape == (N, Cout, H, W)
    err = float(jnp.max(jnp.abs(out - ref)))
    assert jnp.allclose(out, ref, atol=5e-3, rtol=5e-3), err

    print("KERNEL_OK")
</pallas_src>

<mosaic_0001>
module attributes {stable_mosaic.version = 11 : i64} {
  func.func @_double_conv_kernel(%arg0: i32, %arg1: memref<4x256xf32, #tpu.memory_space<vmem>>, %arg2: memref<9x256xf32, #tpu.memory_space<vmem>>, %arg3: memref<8x36xf32, #tpu.memory_space<vmem>>, %arg4: memref<8x1xf32, #tpu.memory_space<vmem>>, %arg5: memref<8x72xf32, #tpu.memory_space<vmem>>, %arg6: memref<8x1xf32, #tpu.memory_space<vmem>>, %arg7: memref<8x256xf32, #tpu.memory_space<vmem>>) attributes {dimension_semantics = [#tpu.dimension_semantics<parallel>], iteration_bounds = array<i64: 2>, scalar_prefetch = 0 : i64, scratch_operands = 0 : i64, tpu.core_type = #tpu.core_type<tc>, window_params = [{transform_indices = @transform_0, window_bounds = array<i64: 4, 256>}, {pipeline_mode = #tpu.pipeline_mode<synchronous>, transform_indices = @transform_1, window_bounds = array<i64: 9, 256>}, {pipeline_mode = #tpu.pipeline_mode<synchronous>, transform_indices = @transform_2, window_bounds = array<i64: 8, 36>}, {pipeline_mode = #tpu.pipeline_mode<synchronous>, transform_indices = @transform_3, window_bounds = array<i64: 8, 1>}, {pipeline_mode = #tpu.pipeline_mode<synchronous>, transform_indices = @transform_4, window_bounds = array<i64: 8, 72>}, {pipeline_mode = #tpu.pipeline_mode<synchronous>, transform_indices = @transform_5, window_bounds = array<i64: 8, 1>}, {transform_indices = @transform_6, window_bounds = array<i64: 8, 256>}]} {
    %c0 = arith.constant 0 : index
    %c0_0 = arith.constant 0 : index
    %0 = vector.load %arg1[%c0, %c0_0] : memref<4x256xf32, #tpu.memory_space<vmem>>, vector<4x256xf32>
    %c0_1 = arith.constant 0 : index
    %c0_2 = arith.constant 0 : index
    %1 = vector.load %arg3[%c0_1, %c0_2] : memref<8x36xf32, #tpu.memory_space<vmem>>, vector<8x36xf32>
    %c17_i32 = arith.constant 17 : i32
    %2 = tpu.dynamic_rotate %0 by %c17_i32 dim 1 : vector<4x256xf32>, i32 -> vector<4x256xf32>
    %c0_3 = arith.constant 0 : index
    %c0_4 = arith.constant 0 : index
    %3 = vector.load %arg2[%c0_3, %c0_4] : memref<9x256xf32, #tpu.memory_space<vmem>>, vector<1x256xf32>
    %4 = vector.broadcast %3 : vector<1x256xf32> to vector<4x256xf32>
    %5 = arith.mulf %2, %4 : vector<4x256xf32>
    %c16_i32 = arith.constant 16 : i32
    %6 = tpu.dynamic_rotate %0 by %c16_i32 dim 1 : vector<4x256xf32>, i32 -> vector<4x256xf32>
    %c1 = arith.constant 1 : index
    %c0_5 = arith.constant 0 : index
    %7 = vector.load %arg2[%c1, %c0_5] : memref<9x256xf32, #tpu.memory_space<vmem>>, vector<1x256xf32>
    %8 = vector.broadcast %7 : vector<1x256xf32> to vector<4x256xf32>
    %9 = arith.mulf %6, %8 : vector<4x256xf32>
    %c15_i32 = arith.constant 15 : i32
    %10 = tpu.dynamic_rotate %0 by %c15_i32 dim 1 : vector<4x256xf32>, i32 -> vector<4x256xf32>
    %c2 = arith.constant 2 : index
    %c0_6 = arith.constant 0 : index
    %11 = vector.load %arg2[%c2, %c0_6] : memref<9x256xf32, #tpu.memory_space<vmem>>, vector<1x256xf32>
    %12 = vector.broadcast %11 : vector<1x256xf32> to vector<4x256xf32>
    %13 = arith.mulf %10, %12 : vector<4x256xf32>
    %c1_i32 = arith.constant 1 : i32
    %14 = tpu.dynamic_rotate %0 by %c1_i32 dim 1 : vector<4x256xf32>, i32 -> vector<4x256xf32>
    %c3 = arith.constant 3 : index
    %c0_7 = arith.constant 0 : index
    %15 = vector.load %arg2[%c3, %c0_7] : memref<9x256xf32, #tpu.memory_space<vmem>>, vector<1x256xf32>
    %16 = vector.broadcast %15 : vector<1x256xf32> to vector<4x256xf32>
    %17 = arith.mulf %14, %16 : vector<4x256xf32>
    %c255_i32 = arith.constant 255 : i32
    %18 = tpu.dynamic_rotate %0 by %c255_i32 dim 1 : vector<4x256xf32>, i32 -> vector<4x256xf32>
    %c5 = arith.constant 5 : index
    %c0_8 = arith.constant 0 : index
    %19 = vector.load %arg2[%c5, %c0_8] : memref<9x256xf32, #tpu.memory_space<vmem>>, vector<1x256xf32>
    %20 = vector.broadcast %19 : vector<1x256xf32> to vector<4x256xf32>
    %21 = arith.mulf %18, %20 : vector<4x256xf32>
    %c241_i32 = arith.constant 241 : i32
    %22 = tpu.dynamic_rotate %0 by %c241_i32 dim 1 : vector<4x256xf32>, i32 -> vector<4x256xf32>
    %c6 = arith.constant 6 : index
    %c0_9 = arith.constant 0 : index
    %23 = vector.load %arg2[%c6, %c0_9] : memref<9x256xf32, #tpu.memory_space<vmem>>, vector<1x256xf32>
    %24 = vector.broadcast %23 : vector<1x256xf32> to vector<4x256xf32>
    %25 = arith.mulf %22, %24 : vector<4x256xf32>
    %c240_i32 = arith.constant 240 : i32
    %26 = tpu.dynamic_rotate %0 by %c240_i32 dim 1 : vector<4x256xf32>, i32 -> vector<4x256xf32>
    %c7 = arith.constant 7 : index
    %c0_10 = arith.constant 0 : index
    %27 = vector.load %arg2[%c7, %c0_10] : memref<9x256xf32, #tpu.memory_space<vmem>>, vector<1x256xf32>
    %28 = vector.broadcast %27 : vector<1x256xf32> to vector<4x256xf32>
    %29 = arith.mulf %26, %28 : vector<4x256xf32>
    %c239_i32 = arith.constant 239 : i32
    %30 = tpu.dynamic_rotate %0 by %c239_i32 dim 1 : vector<4x256xf32>, i32 -> vector<4x256xf32>
    %c8 = arith.constant 8 : index
    %c0_11 = arith.constant 0 : index
    %31 = vector.load %arg2[%c8, %c0_11] : memref<9x256xf32, #tpu.memory_space<vmem>>, vector<1x256xf32>
    %32 = vector.broadcast %31 : vector<1x256xf32> to vector<4x256xf32>
    %33 = arith.mulf %30, %32 : vector<4x256xf32>
    %34 = tpu.concatenate %5, %9, %13, %17, %0, %21, %25, %29, %33 in 0 : vector<4x256xf32>, vector<4x256xf32>, vector<4x256xf32>, vector<4x256xf32>, vector<4x256xf32>, vector<4x256xf32>, vector<4x256xf32>, vector<4x256xf32>, vector<4x256xf32> -> vector<36x256xf32>
    %cst = arith.constant dense<0.000000e+00> : vector<8x256xf32>
    %35 = tpu.matmul %1, %34, %cst {dimension_numbers = #tpu.dot_dimension_numbers<[1], [0], [0], [1], [0, 0, 1, 1], [], []>} : vector<8x36xf32>, vector<36x256xf32>, vector<8x256xf32> -> vector<8x256xf32>
    %c0_12 = arith.constant 0 : index
    %c0_13 = arith.constant 0 : index
    %36 = vector.load %arg4[%c0_12, %c0_13] : memref<8x1xf32, #tpu.memory_space<vmem>>, vector<8x1xf32>
    %37 = vector.broadcast %36 : vector<8x1xf32> to vector<8x256xf32>
    %38 = arith.addf %35, %37 : vector<8x256xf32>
    %cst_14 = arith.constant 0.000000e+00 : f32
    %39 = vector.broadcast %cst_14 : f32 to vector<8x256xf32>
    %40 = arith.maximumf %38, %39 : vector<8x256xf32>
    %c0_15 = arith.constant 0 : index
    %c0_16 = arith.constant 0 : index
    %41 = vector.load %arg5[%c0_15, %c0_16] : memref<8x72xf32, #tpu.memory_space<vmem>>, vector<8x72xf32>
    %c17_i32_17 = arith.constant 17 : i32
    %42 = tpu.dynamic_rotate %40 by %c17_i32_17 dim 1 : vector<8x256xf32>, i32 -> vector<8x256xf32>
    %c0_18 = arith.constant 0 : index
    %c0_19 = arith.constant 0 : index
    %43 = vector.load %arg2[%c0_18, %c0_19] : memref<9x256xf32, #tpu.memory_space<vmem>>, vector<1x256xf32>
    %44 = vector.broadcast %43 : vector<1x256xf32> to vector<8x256xf32>
    %45 = arith.mulf %42, %44 : vector<8x256xf32>
    %c16_i32_20 = arith.constant 16 : i32
    %46 = tpu.dynamic_rotate %40 by %c16_i32_20 dim 1 : vector<8x256xf32>, i32 -> vector<8x256xf32>
    %c1_21 = arith.constant 1 : index
    %c0_22 = arith.constant 0 : index
    %47 = vector.load %arg2[%c1_21, %c0_22] : memref<9x256xf32, #tpu.memory_space<vmem>>, vector<1x256xf32>
    %48 = vector.broadcast %47 : vector<1x256xf32> to vector<8x256xf32>
    %49 = arith.mulf %46, %48 : vector<8x256xf32>
    %c15_i32_23 = arith.constant 15 : i32
    %50 = tpu.dynamic_rotate %40 by %c15_i32_23 dim 1 : vector<8x256xf32>, i32 -> vector<8x256xf32>
    %c2_24 = arith.constant 2 : index
    %c0_25 = arith.constant 0 : index
    %51 = vector.load %arg2[%c2_24, %c0_25] : memref<9x256xf32, #tpu.memory_space<vmem>>, vector<1x256xf32>
    %52 = vector.broadcast %51 : vector<1x256xf32> to vector<8x256xf32>
    %53 = arith.mulf %50, %52 : vector<8x256xf32>
    %c1_i32_26 = arith.constant 1 : i32
    %54 = tpu.dynamic_rotate %40 by %c1_i32_26 dim 1 : vector<8x256xf32>, i32 -> vector<8x256xf32>
    %c3_27 = arith.constant 3 : index
    %c0_28 = arith.constant 0 : index
    %55 = vector.load %arg2[%c3_27, %c0_28] : memref<9x256xf32, #tpu.memory_space<vmem>>, vector<1x256xf32>
    %56 = vector.broadcast %55 : vector<1x256xf32> to vector<8x256xf32>
    %57 = arith.mulf %54, %56 : vector<8x256xf32>
    %c255_i32_29 = arith.constant 255 : i32
    %58 = tpu.dynamic_rotate %40 by %c255_i32_29 dim 1 : vector<8x256xf32>, i32 -> vector<8x256xf32>
    %c5_30 = arith.constant 5 : index
    %c0_31 = arith.constant 0 : index
    %59 = vector.load %arg2[%c5_30, %c0_31] : memref<9x256xf32, #tpu.memory_space<vmem>>, vector<1x256xf32>
    %60 = vector.broadcast %59 : vector<1x256xf32> to vector<8x256xf32>
    %61 = arith.mulf %58, %60 : vector<8x256xf32>
    %c241_i32_32 = arith.constant 241 : i32
    %62 = tpu.dynamic_rotate %40 by %c241_i32_32 dim 1 : vector<8x256xf32>, i32 -> vector<8x256xf32>
    %c6_33 = arith.constant 6 : index
    %c0_34 = arith.constant 0 : index
    %63 = vector.load %arg2[%c6_33, %c0_34] : memref<9x256xf32, #tpu.memory_space<vmem>>, vector<1x256xf32>
    %64 = vector.broadcast %63 : vector<1x256xf32> to vector<8x256xf32>
    %65 = arith.mulf %62, %64 : vector<8x256xf32>
    %c240_i32_35 = arith.constant 240 : i32
    %66 = tpu.dynamic_rotate %40 by %c240_i32_35 dim 1 : vector<8x256xf32>, i32 -> vector<8x256xf32>
    %c7_36 = arith.constant 7 : index
    %c0_37 = arith.constant 0 : index
    %67 = vector.load %arg2[%c7_36, %c0_37] : memref<9x256xf32, #tpu.memory_space<vmem>>, vector<1x256xf32>
    %68 = vector.broadcast %67 : vector<1x256xf32> to vector<8x256xf32>
    %69 = arith.mulf %66, %68 : vector<8x256xf32>
    %c239_i32_38 = arith.constant 239 : i32
    %70 = tpu.dynamic_rotate %40 by %c239_i32_38 dim 1 : vector<8x256xf32>, i32 -> vector<8x256xf32>
    %c8_39 = arith.constant 8 : index
    %c0_40 = arith.constant 0 : index
    %71 = vector.load %arg2[%c8_39, %c0_40] : memref<9x256xf32, #tpu.memory_space<vmem>>, vector<1x256xf32>
    %72 = vector.broadcast %71 : vector<1x256xf32> to vector<8x256xf32>
    %73 = arith.mulf %70, %72 : vector<8x256xf32>
    %74 = tpu.concatenate %45, %49, %53, %57, %40, %61, %65, %69, %73 in 0 : vector<8x256xf32>, vector<8x256xf32>, vector<8x256xf32>, vector<8x256xf32>, vector<8x256xf32>, vector<8x256xf32>, vector<8x256xf32>, vector<8x256xf32>, vector<8x256xf32> -> vector<72x256xf32>
    %cst_41 = arith.constant dense<0.000000e+00> : vector<8x256xf32>
    %75 = tpu.matmul %41, %74, %cst_41 {dimension_numbers = #tpu.dot_dimension_numbers<[1], [0], [0], [1], [0, 0, 1, 1], [], []>} : vector<8x72xf32>, vector<72x256xf32>, vector<8x256xf32> -> vector<8x256xf32>
    %c0_42 = arith.constant 0 : index
    %c0_43 = arith.constant 0 : index
    %76 = vector.load %arg6[%c0_42, %c0_43] : memref<8x1xf32, #tpu.memory_space<vmem>>, vector<8x1xf32>
    %77 = vector.broadcast %76 : vector<8x1xf32> to vector<8x256xf32>
    %78 = arith.addf %75, %77 : vector<8x256xf32>
    %cst_44 = arith.constant 0.000000e+00 : f32
    %79 = vector.broadcast %cst_44 : f32 to vector<8x256xf32>
    %80 = arith.maximumf %78, %79 : vector<8x256xf32>
    %c0_45 = arith.constant 0 : index
    %c0_46 = arith.constant 0 : index
    %81 = vector.load %arg7[%c0_45, %c0_46] : memref<8x256xf32, #tpu.memory_space<vmem>>, vector<8x256xf32>
    tpu.vector_store %arg7[%c0_45, %c0_46], %80 {strides = array<i32>} : memref<8x256xf32, #tpu.memory_space<vmem>>, vector<8x256xf32>,
    return
  }
  func.func @transform_0(%arg0: i32) -> (i32, i32) {
    %c0_i32 = arith.constant 0 : i32
    %c0_i32_0 = arith.constant 0 : i32
    return %c0_i32, %arg0 : i32, i32
  }
  func.func @transform_1(%arg0: i32) -> (i32, i32) {
    %c0_i32 = arith.constant 0 : i32
    %c0_i32_0 = arith.constant 0 : i32
    %c0_i32_1 = arith.constant 0 : i32
    return %c0_i32, %c0_i32_0 : i32, i32
  }
  func.func @transform_2(%arg0: i32) -> (i32, i32) {
    %c0_i32 = arith.constant 0 : i32
    %c0_i32_0 = arith.constant 0 : i32
    %c0_i32_1 = arith.constant 0 : i32
    return %c0_i32, %c0_i32_0 : i32, i32
  }
  func.func @transform_3(%arg0: i32) -> (i32, i32) {
    %c0_i32 = arith.constant 0 : i32
    %c0_i32_0 = arith.constant 0 : i32
    %c0_i32_1 = arith.constant 0 : i32
    return %c0_i32, %c0_i32_0 : i32, i32
  }
  func.func @transform_4(%arg0: i32) -> (i32, i32) {
    %c0_i32 = arith.constant 0 : i32
    %c0_i32_0 = arith.constant 0 : i32
    %c0_i32_1 = arith.constant 0 : i32
    return %c0_i32, %c0_i32_0 : i32, i32
  }
  func.func @transform_5(%arg0: i32) -> (i32, i32) {
    %c0_i32 = arith.constant 0 : i32
    %c0_i32_0 = arith.constant 0 : i32
    %c0_i32_1 = arith.constant 0 : i32
    return %c0_i32, %c0_i32_0 : i32, i32
  }
  func.func @transform_6(%arg0: i32) -> (i32, i32) {
    %c0_i32 = arith.constant 0 : i32
    %c0_i32_0 = arith.constant 0 : i32
    return %c0_i32, %arg0 : i32, i32
  }
}

</mosaic_0001>

<bundles_post_ra>
// kernel: tpu_custom_call.1
= control target key start
LH: loop header
LB: loop body
LE: loop exit
PB: predicated region body
PF: predicated region fallthrough
CT: control target
= control target key end

     0   :  { %11 = vsyncpa [#allocation3], 0  ;;  %s1464_s0 = inlined_call_operand.vmem [shape: f32[4,512], index: 0, kind: input, shape index: {}]   ;;  %s1465_s1 = inlined_call_operand.hbm [shape: f32[9,256], index: 1, kind: input, shape index: {}]   ;;  %s1466_s2 = inlined_call_operand.hbm [shape: f32[8,36], index: 2, kind: input, shape index: {}]   ;;  %s1467_s3 = inlined_call_operand.vmem [shape: f32[8,1], index: 3, kind: input, shape index: {}]   ;;  %s1468_s4 = inlined_call_operand.hbm [shape: f32[8,72], index: 4, kind: input, shape index: {}]   ;;  %s1469_s5 = inlined_call_operand.vmem [shape: f32[8,1], index: 5, kind: input, shape index: {}]   ;;  %s1470_s6 = inlined_call_operand.hbm [shape: f32[8,512], index: 6, kind: output, shape index: {}]  }
   0x1   :  { %12 = vsyncpa [#allocation6], 0 }
   0x2   :  { %13 = vsyncpa [#allocation4], 0 }
   0x3   :  { %15 = vsyncpa [#allocation4 + $0x1], 0  ;;  %s1112_s21 = smov 0   ;;  %s1114_s22 = smov 0  }
   0x4   :  { %s1116_s23 = smov 0   ;;  %s1118_s24 = smov 0  }
   0x5 LB: > { %s1133_s25 = sadd.s32 4294967295, %s1061_s24   ;;  %s793_s26 = sadd.s32 4294967294, %s1061_s24   ;;  %s1061_s24 = sphi %s1118_s24, %s1478_s24   ;;  %s1057_s23 = sphi %s1116_s23, %s1477_s23   ;;  %s1053_s22 = sphi %s1114_s22, %s1476_s22   ;;  %s1049_s21 = sphi %s1112_s21, %s1475_s21  }
   0x6   : > { %s1137_s27 = sadd.s32 1, %s1061_s24   ;;  %s159_s28 = sadd.s32 1, %s1057_s23 }
   0x7   : > { %s156_s29 = ssub.s32 %s1061_s24, %s1137_s27  ;;  %p169_p0 = scmp.ne.s32.totalorder %s1057_s23, %s1053_s22 }
   0x8   : > { %p157_p1 = scmp.eq.s32.totalorder %s156_s29, 0  ;;  %p170_p2 = scmp.eq.s32.totalorder %s1133_s25, 1 }
   0x9   : > { %p175_p3 = scmp.ne.s32.totalorder %s1053_s22, %s1049_s21  ;;  %p176_p4 = scmp.eq.s32.totalorder %s793_s26, 1 }
   0xa   : > { %s1148_s30 = scalar_select %p157_p1, %s1057_s23, %s159_s28  }
   0xb   : > { %p1150_p5 = por %p170_p2, %p169_p0  ;;  %p1154_p6 = por %p176_p4, %p175_p3 }
   0xc   : > { %p794_p7 = scmp.ge.s32.totalorder %s1061_s24, 1  ;;  %p183_p8 = scmp.lt.s32.totalorder %s1061_s24, 3 }
   0xd   : > { %p846_p9 = scmp.eq.s32.totalorder %s1133_s25, 0  ;;  %s209_s12 = sshll.u32 %s1466_s2, 4  ;;  %s210_s12 = int_to_ptr.hbm [resolvable:$true] %s209_s12 }
   0xe   : > { %p1161_p10 = pnand %p794_p7, %p183_p8  ;;  %s1063_s13 = smov [#allocation5]  }
   0xf   : > { %s211_s14 = sshll.u32 %s1063_s13, 4  ;;  %s194_s17 = sshll.u32 %s1465_s1, 4  ;;  %s212_s14 = int_to_ptr.vmem [resolvable:$true] %s211_s14  ;;  %s195_s17 = int_to_ptr.hbm [resolvable:$true] %s194_s17 }
  0x10   : > { %p832_p11 = pneg %p1161_p10  ;;  %s1064_s19 = smov [#allocation2]  }
  0x11   : > { %s196_s20 = sshll.u32 %s1064_s19, 4  ;;  %s1065_s26 = smov 256   ;;  %s197_s20 = int_to_ptr.vmem [resolvable:$true] %s196_s20 }
  0x12   : > { %p1175_p12 = pnand %p846_p9, %p832_p11  ;;  %s1066_s28 = smov 16  }
  0x13   : > { %s224_s11 = sshll.u32 %s1468_s4, 4  ;;  %s1067_s13 = smov [#allocation7]   ;;  %s225_s11 = int_to_ptr.hbm [resolvable:$true] %s224_s11 }
  0x14   : > { %838 = dma.hbm_to_vmem [thread:$0]  (!%p1175_p12), %s210_s12, 128, %s212_s14, [#allocation6]  }
  0x15   : > { %835 = dma.hbm_to_vmem [thread:$0]  (!%p1175_p12), %s195_s17, 512, %s197_s20, [#allocation3], %s1065_s26, %s1065_s26, %s1066_s28  }
  0x16   : > { %s226_s15 = sshll.u32 %s1067_s13, 4  ;;  %251 = sbr.rel (%p1161_p10) target bundleno = 662 (0x296), region = 44  ;;  %s227_s15 = int_to_ptr.vmem [resolvable:$true] %s226_s15 }
  0x17   : > { %841 = dma.hbm_to_vmem [thread:$0]  (!%p1175_p12), %s225_s11, 128, %s227_s15, [#allocation6]  }
  0x1b   : > { %1036 = dma.done.wait (%p846_p9), [#allocation3], 512  }
  0x1c   : > { %1038 = vsyncadd (%p846_p9), [#allocation3], 4294966784 }
  0x1d   : > { %1040 = dma.done.wait (%p846_p9), [#allocation6], 256  }
  0x1e   : > { %1042 = vsyncadd (%p846_p9), [#allocation6], 4294967040  ;;  %s804_s12 = sshll.u32 %s1133_s25, 1  ;;  %s1068_s18 = smov 16   ;;  %v311_v25 = vlaneseq  ;;  %v509_v27 = vld [vmem:[%s1467_s3] sm:$0xff]  ;;  %v1076_v28 = vmov 0  }
  0x1f   : > { %p293_p13 = scmp.lt.s32.totalorder %s804_s12, 3  ;;  %s1069_s19 = smov 15   ;;  %899 = vset.pattern.permute.xlu1 %v1076_v28  ;;  %900 = vset.pattern.permute.xlu0 %v1076_v28  ;;  %v1229_v30 = vld [vmem:[#allocation2 + $0x5] ss:$8 sm:$0x3]  ;;  %vm500_vm6 = vcmask 1043456  }
  0x20   : > { %s1070_s20 = smov 1   ;;  %s1071_s26 = smov 127   ;;  %v1227_v29 = vand.u32 127, %v311_v25  ;;  %v1232_v31 = vld [vmem:[#allocation2 + $0x7] ss:$8 sm:$0x3] }
  0x21   : > { %s1480_s12 = smov (!%p293_p13, %s804_s12), 3  ;;  %s1072_s28 = smov 113   ;;  %v1235_v33 = vld [vmem:[#allocation2 + $0x1] ss:$8 sm:$0x3]  ;;  %v402_v34 = vperm.slane %v1229_v30, 0 }
  0x22   : > { %s805_s14 = sshll.u32 %s1480_s12, 2  ;;  %s1073_s29 = smov 112   ;;  %vm396_vm0 = vcmp.lt.s32.totalorder %v1227_v29, 127  ;;  %vm438_vm1 = vcmp.lt.s32.totalorder %v1227_v29, 112  ;;  %v444_v39 = vperm.slane %v1232_v31, 0  ;;  %v445_v40 = vperm.slane %v1232_v31, 1 }
  0x23   : > { %s296_s17 = scalar_lea.vmem %s1464_s0, %s805_s14  ;;  %s1074_s10 = smov 17   ;;  %v1238_v37 = vld [vmem:[#allocation2 + $0x3] ss:$8 sm:$0x3]  ;;  %v339_v43 = vperm.slane %v1235_v33, 0  ;;  %v403_v44 = vperm.slane %v1229_v30, 1 }
  0x24   : > { %v299_v0 = vld [vmem:[%s296_s17] sm:$0xff]  ;;  %s1075_s11 = smov 111   ;;  %v340_v46 = vperm.slane %v1235_v33, 1  ;;  %v381_v47 = vperm.slane %v1238_v37, 0  ;;  %vm375_vm2 = vcmp.lt.s32.totalorder %v1227_v29, 1  ;;  %vm417_vm3 = vcmp.lt.s32.totalorder %v1227_v29, 113 }
  0x25   : > { %302 = vst [vmem:[#allocation1] ss:$2 sm:$0xff] %v299_v0  ;;  %v1250_v45 = vld [vmem:[#allocation2 + $0x10] ss:$8 sm:$0x3]  ;;  %v382_v53 = vperm.slane %v1238_v37, 1 }
  0x26   : > { %v1254_v48 = vld [vmem:[#allocation2 + $0x6] ss:$8 sm:$0x3]  ;;  %vm459_vm4 = vcmp.lt.s32.totalorder %v1227_v29, 111  ;;  %v465_v54 = vperm.slane %v1250_v45, 0  ;;  %v466_v55 = vperm.slane %v1250_v45, 1 }
  0x27   : > { %vm333_vm5 = vcmp.lt.s32.totalorder %v1227_v29, 16  ;;  %v423_v56 = vperm.slane %v1254_v48, 0  ;;  %v424_v57 = vperm.slane %v1254_v48, 1  ;;  %vm313_vm7 = vcmp.lt.s32.totalorder %v1227_v29, 17  ;;  %s289_s16 = sand.u32 1, %s1053_s22   ;;  %s817_s17 = sshll.u32 %s1133_s25, 4 }
  0x28   : > { %vm354_vm8 = vcmp.lt.s32.totalorder %v1227_v29, 15  ;;  %vm515_vm9 = vcmask 293888   ;;  %vm638_vm10 = vcmask 588800   ;;  %s803_s9 = sshll.u32 %s289_s16, 4  ;;  %s687_s25 = scalar_lea.sflag [#allocation4], %s289_s16 }
  0x29   : > { %s1011_s12 = scalar_lea.hbm %s1470_s6, 32 }
  0x2c   : > { %v303_v1 = vld.sshfl [vmem:[#allocation1] sm:$0xff pattern:$0x75316420]  ;;  %v304_v2 = vld.sshfl [vmem:[#allocation1 + $0x8] sm:$0xff pattern:$0x75316420] }
  0x2d   : > { %324 = vst [vmem:[#allocation1] ss:$2 sm:$0xff] %v299_v0 }
  0x34   : > { %v325_v3 = vld.sshfl [vmem:[#allocation1] sm:$0xff pattern:$0x75316420]  ;;  %v326_v4 = vld.sshfl [vmem:[#allocation1 + $0x8] sm:$0xff pattern:$0x75316420] }
  0x35   : > { %345 = vst [vmem:[#allocation1] ss:$2 sm:$0xff] %v299_v0  ;;  %329 = vrot.lane.b32.xlu1 %v325_v3, %s1068_s18  ;;  %331 = vrot.lane.b32.xlu2 %v326_v4, %s1068_s18 }
  0x3c   : > { %v346_v5 = vld.sshfl [vmem:[#allocation1] sm:$0xff pattern:$0x75316420]  ;;  %v347_v6 = vld.sshfl [vmem:[#allocation1 + $0x8] sm:$0xff pattern:$0x75316420] }
  0x3d   : > { %350 = vrot.lane.b32.xlu0 %v346_v5, %s1069_s19  ;;  %366 = vst [vmem:[#allocation1] ss:$2 sm:$0xff] %v299_v0  ;;  %v1287_v5 = vld [vmem:[#allocation2] ss:$8 sm:$0x3] }
  0x44   : > { %v367_v7 = vld.sshfl [vmem:[#allocation1] sm:$0xff pattern:$0x75316420]  ;;  %v368_v8 = vld.sshfl [vmem:[#allocation1 + $0x8] sm:$0xff pattern:$0x75316420] }
  0x45   : > { %373 = vrot.lane.b32.xlu0 %v368_v8, %s1070_s20  ;;  %387 = vst [vmem:[#allocation1] ss:$2 sm:$0xff] %v299_v0  ;;  %371 = vrot.lane.b32.xlu2 %v367_v7, %s1070_s20 }
  0x4c   : > { %v388_v9 = vld.sshfl [vmem:[#allocation1] sm:$0xff pattern:$0x75316420]  ;;  %v389_v10 = vld.sshfl [vmem:[#allocation1 + $0x8] sm:$0xff pattern:$0x75316420] }
  0x4d   : > { %408 = vst [vmem:[#allocation1] ss:$2 sm:$0xff] %v299_v0  ;;  %392 = vrot.lane.b32.xlu2 %v388_v9, %s1071_s26 }
  0x54   : > { %v409_v11 = vld.sshfl [vmem:[#allocation1] sm:$0xff pattern:$0x75316420]  ;;  %v410_v12 = vld.sshfl [vmem:[#allocation1 + $0x8] sm:$0xff pattern:$0x75316420] }
  0x55   : > { %413 = vrot.lane.b32.xlu0 %v409_v11, %s1072_s28  ;;  %415 = vrot.lane.b32.xlu1 %v410_v12, %s1072_s28  ;;  %429 = vst [vmem:[#allocation1] ss:$2 sm:$0xff] %v299_v0  ;;  %v1298_v11 = vld [vmem:[#allocation2 + $0x2] ss:$8 sm:$0x3] }
  0x56   : > { %394 = vrot.lane.b32.xlu2 %v389_v10, %s1071_s26  ;;  %v360_v25 = vperm.slane %v1298_v11, 0 }
  0x5c   : > { %v430_v13 = vld.sshfl [vmem:[#allocation1] sm:$0xff pattern:$0x75316420]  ;;  %v431_v14 = vld.sshfl [vmem:[#allocation1 + $0x8] sm:$0xff pattern:$0x75316420] }
  0x5d   : > { %434 = vrot.lane.b32.xlu0 %v430_v13, %s1073_s29  ;;  %450 = vst [vmem:[#allocation1] ss:$2 sm:$0xff] %v299_v0 }
  0x5e   : > { %307 = vrot.lane.b32.xlu2 %v303_v1, %s1074_s10 }
  0x64   : > { %v451_v15 = vld.sshfl [vmem:[#allocation1] sm:$0xff pattern:$0x75316420]  ;;  %v452_v16 = vld.sshfl [vmem:[#allocation1 + $0x8] sm:$0xff pattern:$0x75316420] }
  0x65   : > { %436 = vrot.lane.b32.xlu0 %v431_v14, %s1073_s29  ;;  %455 = vrot.lane.b32.xlu1 %v451_v15, %s1075_s11  ;;  %483 = vst [vmem:[#allocation1] ss:$2 sm:$0xff] %v299_v0 }
  0x6d   : > { %309 = vrot.lane.b32.xlu0 %v304_v2, %s1074_s10  ;;  %457 = vrot.lane.b32.xlu1 %v452_v16, %s1075_s11 }
  0x75   : > { %352 = vrot.lane.b32.xlu1 %v347_v6, %s1069_s19 }
  0x7d   : > { %512 = vperm.xlu1 %899, %v509_v27  }
  0x8f   : > { %v1220_v18 = vpop.permute.xlu2 %331 }
  0x9f   : > { %v372_v20 = vpop.permute.xlu2 %371 }
  0xa7   : > { %v1222_v21 = vpop.permute.xlu1 %329  ;;  %v393_v23 = vpop.permute.xlu2 %392 }
  0xa8   : > { %v334_v12 = vsel %vm333_vm5, %v1222_v21, %v1220_v18  ;;  %v335_v13 = vsel %vm333_vm5, %v1220_v18, %v1222_v21  ;;  %v319_v21 = vperm.slane %v1287_v5, 1 }
  0xaf   : > { %v1218_v17 = vpop.permute.xlu0 %350 }
  0xb0   : > { %v395_v32 = vpop.permute.xlu2 %394 }
  0xb1   : > { %v397_v38 = vsel %vm396_vm0, %v393_v23, %v395_v32  ;;  %v398_v49 = vsel %vm396_vm0, %v395_v32, %v393_v23  ;;  %v318_v23 = vperm.slane %v1287_v5, 0 }
  0xb2   : > { %v406_v50 = vmul.f32 %v402_v34, %v397_v38  ;;  %v407_v58 = vmul.f32 %v403_v44, %v398_v49  ;;  %v344_v38 = vmul.f32 %v340_v46, %v334_v12 }
  0xb4   : > { %v490_v62 = vrot.slane %v406_v50, 4  ;;  %v491_v10 = vrot.slane %v407_v58, 4 }
  0xb7   : > { %v374_v19 = vpop.permute.xlu0 %373 }
  0xb8   : > { %v377_v59 = vsel %vm375_vm2, %v374_v19, %v372_v20  ;;  %v376_v4 = vsel %vm375_vm2, %v372_v20, %v374_v19  ;;  %v308_v15 = vpop.permute.xlu2 %307  ;;  %v484_v19 = vld.sshfl [vmem:[#allocation1] sm:$0xff pattern:$0x75316420]  ;;  %v485_v20 = vld.sshfl [vmem:[#allocation1 + $0x8] sm:$0xff pattern:$0x75316420] }
  0xb9   : > { %v385_v14 = vmul.f32 %v381_v47, %v377_v59  ;;  %v505_v32 = vsel %vm500_vm6, %v484_v19, %v490_v62  ;;  %v474_v62 = vrot.slane %v344_v38, 4 }
  0xc7   : > { %v414_v22 = vpop.permute.xlu0 %413  ;;  %v416_v24 = vpop.permute.xlu1 %415 }
  0xc8   : > { %v418_v60 = vsel %vm417_vm3, %v414_v22, %v416_v24  ;;  %v419_v61 = vsel %vm417_vm3, %v416_v24, %v414_v22  ;;  %v386_v22 = vmul.f32 %v382_v53, %v376_v4 }
  0xc9   : > { %v427_v8 = vmul.f32 %v423_v56, %v418_v60  ;;  %v428_v9 = vmul.f32 %v424_v57, %v419_v61 }
  0xca   : > { %v480_v49 = vrot.slane %v386_v22, 4 }
  0xcf   : > { %v435_v26 = vpop.permute.xlu0 %434 }
  0xd7   : > { %v437_v35 = vpop.permute.xlu0 %436  ;;  %v456_v36 = vpop.permute.xlu1 %455 }
  0xd8   : > { %v439_v41 = vsel %vm438_vm1, %v435_v26, %v437_v35  ;;  %v440_v42 = vsel %vm438_vm1, %v437_v35, %v435_v26  ;;  %v361_v26 = vperm.slane %v1298_v11, 1  ;;  %v506_v35 = vsel %vm500_vm6, %v485_v20, %v491_v10 }
  0xd9   : > { %v448_v51 = vmul.f32 %v444_v39, %v439_v41  ;;  %v449_v52 = vmul.f32 %v445_v40, %v440_v42  ;;  %v479_v42 = vrot.slane %v385_v14, 4 }
  0xdb   : > { %v496_v0 = vrot.slane %v448_v51, 4  ;;  %v497_v1 = vrot.slane %v449_v52, 4 }
  0xdd   : > { %v507_v24 = vsel %vm500_vm6, %v427_v8, %v496_v0  ;;  %v508_v18 = vsel %vm500_vm6, %v428_v9, %v497_v1 }
  0xdf   : > { %v458_v63 = vpop.permute.xlu1 %457  ;;  %v310_v16 = vpop.permute.xlu0 %309 }
  0xe0   : > { %v460_v2 = vsel %vm459_vm4, %v456_v36, %v458_v63  ;;  %v461_v3 = vsel %vm459_vm4, %v458_v63, %v456_v36  ;;  %v314_v27 = vsel %vm313_vm7, %v308_v15, %v310_v16  ;;  %v315_v28 = vsel %vm313_vm7, %v310_v16, %v308_v15 }
  0xe1   : > { %v469_v6 = vmul.f32 %v465_v54, %v460_v2  ;;  %v470_v7 = vmul.f32 %v466_v55, %v461_v3  ;;  %v343_v36 = vmul.f32 %v339_v43, %v335_v13  ;;  %v322_v52 = vmul.f32 %v318_v23, %v315_v28 }
  0xe2   : > { %v323_v58 = vmul.f32 %v319_v21, %v314_v27 }
  0xe3   : > { %806 = vmatpush.msk.msra.mxu0 %vm500_vm6, %v469_v6  ;;  %808 = vmatpush.msk.msra.mxu1 %vm500_vm6, %v470_v7  ;;  %v473_v61 = vrot.slane %v343_v36, 4 }
  0xe4   : > { %v502_v2 = vsel %vm500_vm6, %v323_v58, %v474_v62 }
  0xe5   : > { %537 = vmatpush.msra.mxu0 %v507_v24  ;;  %557 = vmatpush.msra.mxu1 %v508_v18  ;;  %v501_v1 = vsel %vm500_vm6, %v322_v52, %v473_v61 }
  0xe7   : > { %v353_v41 = vpop.permute.xlu1 %352  ;;  %538 = vmatpush.msra.mxu0 %v505_v32  ;;  %558 = vmatpush.msra.mxu1 %v506_v35  ;;  %v632_v35 = vld [vmem:[%s1469_s5] sm:$0xff] }
  0xe8   : > { %v355_v50 = vsel %vm354_vm8, %v1218_v17, %v353_v41  ;;  %v356_v51 = vsel %vm354_vm8, %v353_v41, %v1218_v17  ;;  %v300_v17 = vld [vmem:[#allocation5] sm:$0xff] }
  0xe9   : > { %v364_v59 = vmul.f32 %v360_v25, %v356_v51  ;;  %v365_v60 = vmul.f32 %v361_v26, %v355_v50 }
  0xeb   : > { %v503_v63 = vsel %vm500_vm6, %v364_v59, %v479_v42  ;;  %v504_v0 = vsel %vm500_vm6, %v365_v60, %v480_v49 }
  0xec   : > { %539 = vmatpush.msra.mxu0 %v503_v63  ;;  %559 = vmatpush.msra.mxu1 %v504_v0 }
  0xee   : > { %540 = vmatpush.msra.mxu0 %v501_v1  ;;  %560 = vmatpush.msra.mxu1 %v502_v2  ;;  %v567_v2 = vld [vmem:[#allocation7] sm:$0xff] }
  0xef   : > { %807 = vmatmul.msk.f32.vlgmr.msra.gmra.mxu0 %vm515_vm9, %v300_v17  ;;  %809 = vmatmul.msk.f32.vlgmr.msra.gmra.mxu1 %vm515_vm9, %v300_v17  ;;  %v513_v3 = vpop.permute.xlu1 %512 }
 0x16c   : > { %v542_v4 = vpop.f32.mrf.mxu0  ;;  %v562_v6 = vpop.f32.mrf.mxu1 }
 0x16d   : > { %v543_v7 = vadd.f32 %v542_v4, %v513_v3  ;;  %v563_v8 = vadd.f32 %v562_v6, %v513_v3 }
 0x16f   : > { %v565_v9 = vmax.f32 %v543_v7, 0.0  ;;  %v566_v10 = vmax.f32 %v563_v8, 0.0 }
 0x171   : > { %626 = vrot.lane.b32.xlu0 %v566_v10, %s1075_s11  ;;  %616 = vrot.lane.b32.xlu1 %v565_v9, %s1073_s29 }
 0x172   : > { %624 = vrot.lane.b32.xlu2 %v565_v9, %s1075_s11 }
 0x179   : > { %608 = vrot.lane.b32.xlu0 %v565_v9, %s1072_s28  ;;  %610 = vrot.lane.b32.xlu1 %v566_v10, %s1072_s28 }
 0x17a   : > { %618 = vrot.lane.b32.xlu2 %v566_v10, %s1073_s29 }
 0x181   : > { %602 = vrot.lane.b32.xlu0 %v566_v10, %s1071_s26  ;;  %592 = vrot.lane.b32.xlu1 %v565_v9, %s1070_s20 }
 0x182   : > { %600 = vrot.lane.b32.xlu2 %v565_v9, %s1071_s26  ;;  %s291_s26 = scalar_lea.vmem [#allocation8], %s803_s9 }
 0x183   : > { %s700_s28 = sshll.u32 %s291_s26, 4  ;;  %s701_s28 = int_to_ptr.vmem [resolvable:$true] %s700_s28 }
 0x189   : > { %584 = vrot.lane.b32.xlu0 %v565_v9, %s1069_s19  ;;  %586 = vrot.lane.b32.xlu1 %v566_v10, %s1069_s19 }
 0x18a   : > { %594 = vrot.lane.b32.xlu2 %v566_v10, %s1070_s20  ;;  %s698_s20 = scalar_lea.hbm %s1470_s6, %s817_s17 }
 0x18b   : > { %s702_s29 = sshll.u32 %s698_s20, 4  ;;  %s703_s29 = int_to_ptr.hbm [resolvable:$true] %s702_s29 }
 0x191   : > { %578 = vrot.lane.b32.xlu0 %v566_v10, %s1068_s18  ;;  %568 = vrot.lane.b32.xlu1 %v565_v9, %s1074_s10 }
 0x192   : > { %576 = vrot.lane.b32.xlu2 %v565_v9, %s1068_s18 }
 0x199   : > { %635 = vperm.xlu0 %900, %v632_v35  }
 0x19a   : > { %570 = vrot.lane.b32.xlu2 %v566_v10, %s1074_s10  ;;  %s1005_s10 = sshra.s32 %s703_s29, 4  ;;  %s1006_s10 = int_to_ptr.hbm [resolvable:$true] %s1005_s10 }
 0x19b   : > { %s1007_s11 = scalar_lea.hbm %s1006_s10, 16  ;;  %p1012_p3 = scmp.lt.s32.totalorder %s1006_s10, %s1470_s6 }
 0x19c   : > { %p1008_p0 = scmp.ne.s32.totalorder %s1006_s10, %s1007_s11  ;;  %p1013_p4 = scmp.lt.s32.totalorder %s1011_s12, %s1007_s11 }
 0x19e   : > { %p1009_p1 = pnand %p1008_p0, %p1150_p5  ;;  %p1014_p7 = por %p1013_p4, %p1012_p3 }
 0x1a0   : > { %p1010_p2 = pneg %p1009_p1 }
 0x1a2   : > { %p1015_p8 = pnand %p1014_p7, %p1010_p2 }
 0x1cc   : > { %v625_v12 = vpop.permute.xlu2 %624 }
 0x1d4   : > { %v619_v13 = vpop.permute.xlu2 %618 }
 0x1dc   : > { %v601_v16 = vpop.permute.xlu2 %600 }
 0x1e3   : > { %v627_v14 = vpop.permute.xlu0 %626  ;;  %v617_v15 = vpop.permute.xlu1 %616 }
 0x1e4   : > { %v620_v19 = vsel %vm438_vm1, %v617_v15, %v619_v13  ;;  %v621_v20 = vsel %vm438_vm1, %v619_v13, %v617_v15  ;;  %v628_v22 = vsel %vm459_vm4, %v625_v12, %v627_v14  ;;  %v629_v24 = vsel %vm459_vm4, %v627_v14, %v625_v12 }
 0x1e5   : > { %v630_v18 = vmul.f32 %v628_v22, %v465_v54  ;;  %v631_v27 = vmul.f32 %v629_v24, %v466_v55  ;;  %v622_v28 = vmul.f32 %v620_v19, %v444_v39  ;;  %v623_v32 = vmul.f32 %v621_v20, %v445_v40  ;;  %v595_v40 = vpop.permute.xlu2 %594 }
 0x1e7   : > { %649 = vmatpush.msra.mxu2 %v630_v18  ;;  %669 = vmatpush.msra.mxu3 %v631_v27 }
 0x1e9   : > { %650 = vmatpush.msra.mxu2 %v622_v28  ;;  %670 = vmatpush.msra.mxu3 %v623_v32 }
 0x1eb   : > { %v609_v36 = vpop.permute.xlu0 %608  ;;  %v611_v38 = vpop.permute.xlu1 %610 }
 0x1ec   : > { %v612_v45 = vsel %vm417_vm3, %v609_v36, %v611_v38  ;;  %v613_v54 = vsel %vm417_vm3, %v611_v38, %v609_v36 }
 0x1ed   : > { %v614_v39 = vmul.f32 %v612_v45, %v423_v56  ;;  %v615_v31 = vmul.f32 %v613_v54, %v424_v57  ;;  %v577_v51 = vpop.permute.xlu2 %576 }
 0x1ef   : > { %651 = vmatpush.msra.mxu2 %v614_v39  ;;  %671 = vmatpush.msra.mxu3 %v615_v31 }
 0x1f3   : > { %v603_v55 = vpop.permute.xlu0 %602  ;;  %v593_v41 = vpop.permute.xlu1 %592 }
 0x1f4   : > { %v604_v42 = vsel %vm396_vm0, %v601_v16, %v603_v55  ;;  %v605_v49 = vsel %vm396_vm0, %v603_v55, %v601_v16  ;;  %v596_v48 = vsel %vm375_vm2, %v593_v41, %v595_v40  ;;  %v597_v57 = vsel %vm375_vm2, %v595_v40, %v593_v41 }
 0x1f5   : > { %v606_v50 = vmul.f32 %v604_v42, %v402_v34  ;;  %v607_v56 = vmul.f32 %v605_v49, %v403_v44  ;;  %v598_v52 = vmul.f32 %v597_v57, %v381_v47  ;;  %v599_v34 = vmul.f32 %v596_v48, %v382_v53  ;;  %v571_v37 = vpop.permute.xlu2 %570 }
 0x1f7   : > { %652 = vmatpush.msra.mxu2 %v606_v50  ;;  %672 = vmatpush.msra.mxu3 %v607_v56 }
 0x1f9   : > { %653 = vmatpush.msra.mxu2 %v565_v9  ;;  %673 = vmatpush.msra.mxu3 %v566_v10 }
 0x1fb   : > { %v585_v58 = vpop.permute.xlu0 %584  ;;  %v587_v30 = vpop.permute.xlu1 %586  ;;  %654 = vmatpush.msra.mxu2 %v598_v52  ;;  %674 = vmatpush.msra.mxu3 %v599_v34 }
 0x1fc   : > { %v588_v44 = vsel %vm354_vm8, %v585_v58, %v587_v30  ;;  %v589_v59 = vsel %vm354_vm8, %v587_v30, %v585_v58 }
 0x1fd   : > { %v590_v60 = vmul.f32 %v589_v59, %v360_v25  ;;  %v591_v61 = vmul.f32 %v588_v44, %v361_v26 }
 0x1ff   : > { %655 = vmatpush.msra.mxu2 %v590_v60  ;;  %675 = vmatpush.msra.mxu3 %v591_v61 }
 0x203   : > { %v579_v47 = vpop.permute.xlu0 %578  ;;  %v569_v53 = vpop.permute.xlu1 %568 }
 0x204   : > { %v580_v62 = vsel %vm333_vm5, %v577_v51, %v579_v47  ;;  %v581_v63 = vsel %vm333_vm5, %v579_v47, %v577_v51  ;;  %v572_v0 = vsel %vm313_vm7, %v569_v53, %v571_v37  ;;  %v573_v11 = vsel %vm313_vm7, %v571_v37, %v569_v53 }
 0x205   : > { %v582_v25 = vmul.f32 %v581_v63, %v339_v43  ;;  %v583_v26 = vmul.f32 %v580_v62, %v340_v46  ;;  %v574_v17 = vmul.f32 %v573_v11, %v318_v23  ;;  %v575_v1 = vmul.f32 %v572_v0, %v319_v21 }
 0x207   : > { %656 = vmatpush.msra.mxu2 %v582_v25  ;;  %676 = vmatpush.msra.mxu3 %v583_v26 }
 0x209   : > { %657 = vmatpush.msra.mxu2 %v574_v17  ;;  %677 = vmatpush.msra.mxu3 %v575_v1 }
 0x20a   : > { %810 = vmatmul.msk.f32.vlgmr.msra.gmra.mxu2 %vm638_vm10, %v567_v2  ;;  %811 = vmatmul.msk.f32.vlgmr.msra.gmra.mxu3 %vm638_vm10, %v567_v2 }
 0x20b   : > { %v636_v29 = vpop.permute.xlu0 %635 }
 0x28d   : > { %v659_v33 = vpop.f32.mrf.mxu2  ;;  %v679_v43 = vpop.f32.mrf.mxu3 }
 0x28e   : > { %v660_v46 = vadd.f32 %v659_v33, %v636_v29  ;;  %v680_v5 = vadd.f32 %v679_v43, %v636_v29 }
 0x290   : > { %v682_v23 = vmax.f32 %v660_v46, 0.0  ;;  %v683_v21 = vmax.f32 %v680_v5, 0.0 }
 0x292   : > { %684 = vst [vmem:[%s291_s26] sm:$0xff] %v682_v23 }
 0x293   : > { %685 = vst [vmem:[%s291_s26 + $0x8] sm:$0xff] %v683_v21 }
 0x294   : > { %1018 = shalt.err (!%p1015_p8)
}
 0x295   : > { %830 = dma.vmem_to_hbm [thread:$0]  (%p1150_p5), %s701_s28, 256, %s703_s29, %s687_s25  }
 0x296 PF: > { %p852_p9 = scmp.ge.s32.totalorder %s1061_s24, 2  ;;  %s714_s16 = sand.u32 1, %s1049_s21  }
 0x297   : > { %s715_s17 = scalar_lea.sflag [#allocation4], %s714_s16 }
 0x298   : > { %p843_p10 = pnand %p852_p9, %p1154_p6 }
 0x29a   : > { %p844_p11 = pneg %p843_p10 }
 0x29c   : > { %1044 = dma.done.wait (%p844_p11), %s715_s17, 256  }
 0x29d   : > { %1046 = vsyncadd (%p844_p11), %s715_s17, 4294967040  ;;  %p18_p12 = scmp.ge.s32.totalorder %s1137_s27, 4   ;;  %s1475_s21 = smov %s1053_s22 }
 0x29e   : > { %s1476_s22 = smov %s1057_s23  ;;  %s1477_s23 = smov %s1148_s30 }
 0x29f   : > { %s1478_s24 = smov %s1137_s27  ;;  %20 = sbr.rel (!%p18_p12) target bundleno = 5 (0x5), region = 99 }
 0x2a4   :  { %721 = vsyncpa [#allocation3], 1 }
 0x2a5   :  { %723 = vsyncpa [#allocation3 + $0x1], 1 }
 0x2a6   :  { %724 = vsyncpa [#allocation6], 1 }
 0x2a7   :  { %725 = vsyncpa [#allocation4], 1 }
 0x2a8   :  { %727 = vsyncpa [#allocation4 + $0x1], 1 }

</bundles_post_ra>
